<compile_context>
chip_gen: v7x
topology: tpu7x:2x2x1
jax: 0.10.0
libtpu: 0.0.40
codegen_flags: <defaults>
</compile_context>

<pallas_src>
import functools

import jax
import jax.numpy as jnp
from jax import lax
from jax.experimental import pallas as pl
from jax.experimental.pallas import tpu as pltpu


def _round_up(x: int, m: int) -> int:
    return (x + m - 1) // m * m


def _policy_loss_kernel(*refs, clip_eps: float, B: int, S: int, has_mask: bool):
    if has_mask:
        (lp_ref, olp_ref, adv_ref, mask_ref,
         loss_ref, rsum_ref, rmax_ref,
         row_num, row_den, r_sum, r_max) = refs
    else:
        (lp_ref, olp_ref, adv_ref,
         loss_ref, rsum_ref, rmax_ref,
         row_num, r_sum, r_max) = refs
        mask_ref = None
        row_den = None

    TB, TS = lp_ref.shape
    i = pl.program_id(0)            # batch-block index ("parallel")
    j = pl.program_id(1)            # seq-block index ("arbitrary", innermost)
    ns = pl.num_programs(1)

    pad_rows = (B % TB) != 0        # static (Python) booleans
    pad_cols = (S % TS) != 0

    # ---- init per-row accumulators at the first seq step --------------------
    @pl.when(j == 0)
    def _():
        row_num[...] = jnp.zeros_like(row_num)
        r_sum[...] = jnp.zeros_like(r_sum)
        r_max[...] = jnp.full_like(r_max, -jnp.inf)
        if has_mask:
            row_den[...] = jnp.zeros_like(row_den)

    lp = lp_ref[...].astype(jnp.float32)
    olp = olp_ref[...].astype(jnp.float32)
    adv = adv_ref[...].astype(jnp.float32)
    d = lp - olp

    if has_mask:
        am = mask_ref[...].astype(jnp.float32)
        ratio_full = jnp.exp(d * am)
    else:
        am = None
        ratio_full = jnp.exp(d)

    # Inputs are zero-padded in the wrapper, so the loss path is exact without
    # any validity mask (loss contribution of padded positions is exactly 0).
    # Only the ratio statistics need masking, since exp(0) == 1 in padding.
    row_ids = None
    valid = None
    if pad_rows or pad_cols:
        if pad_rows:
            row_ids = i * TB + lax.broadcasted_iota(jnp.int32, (TB, TS), 0)
        if pad_cols:
            col_ids = j * TS + lax.broadcasted_iota(jnp.int32, (TB, TS), 1)
        if pad_rows and pad_cols:
            valid = (row_ids < B) & (col_ids < S)
        elif pad_rows:
            valid = row_ids < B
        else:
            valid = col_ids < S

    if valid is not None:
        ratio_stats = jnp.where(valid, ratio_full, 0.0)
        ratio_max_e = jnp.where(valid, ratio_full, -jnp.inf)
    else:
        ratio_stats = ratio_full
        ratio_max_e = ratio_full

    ratio = jnp.clip(ratio_full, 0.0, 10.0)
    surr1 = ratio * adv
    surr2 = jnp.clip(ratio, 1.0 - clip_eps, 1.0 + clip_eps) * adv
    loss_elem = -jnp.minimum(surr1, surr2)

    if has_mask:
        loss_w = loss_elem * am
        row_den[...] += jnp.sum(am, axis=1, keepdims=True)
    else:
        loss_w = loss_elem

    row_num[...] += jnp.sum(loss_w, axis=1, keepdims=True)
    r_sum[...] += jnp.sum(ratio_stats, axis=1, keepdims=True)
    r_max[...] = jnp.maximum(r_max[...],
                             jnp.max(ratio_max_e, axis=1, keepdims=True))

    # ---- finalize at the last seq step: emit per-batch-block partials -------
    @pl.when(j == ns - 1)
    def _():
        num = row_num[...]                               # (TB, 1)
        if has_mask:
            # Matches torch masked_mean: a real fully-masked row -> NaN.
            row_loss = num / row_den[...]
            if pad_rows:
                rvalid = row_ids[:, 0:1] < B             # (TB, 1)
                row_loss = jnp.where(rvalid, row_loss, 0.0)   # drop padded rows
        else:
            row_loss = num * (1.0 / S)                   # padded rows are 0

        loss_block = jnp.sum(row_loss)                   # sum of row means
        rsum_block = jnp.sum(r_sum[...])
        rmax_block = jnp.max(r_max[...])                 # padded rows are -inf

        loss_ref[...] = jnp.full(loss_ref.shape, loss_block, jnp.float32)
        rsum_ref[...] = jnp.full(rsum_ref.shape, rsum_block, jnp.float32)
        rmax_ref[...] = jnp.full(rmax_ref.shape, rmax_block, jnp.float32)


def policy_loss(log_probs, old_log_probs, advantages, action_mask=None,
                clip_eps: float = 0.2, skip_threshold: float = 20.0,
                max_block_batch: int = 256, max_block_seq: int = 1024):
    """Returns (loss, skip, ratio_max) like the PyTorch PolicyLoss.forward."""
    B, S = log_probs.shape
    has_mask = action_mask is not None

    # Sublane tile is a multiple of 32 (so bf16 (16,128) and int8/bool (32,128)
    # native tilings stay aligned); lane tile is a multiple of 128, capped at
    # 1024 so 3-4 double-buffered f32 streams stay ~1 MiB/tile (fits v7x VMEM).
    TB = min(_round_up(B, 32), max_block_batch)
    TS = min(_round_up(S, 128), max_block_seq)
    B_pad = _round_up(B, TB)
    S_pad = _round_up(S, TS)
    nb = B_pad // TB
    ns = S_pad // TS

    def _pad(x):
        if x.shape == (B_pad, S_pad):
            return x
        return jnp.pad(x, ((0, B_pad - B), (0, S_pad - S)))

    inputs = [_pad(log_probs), _pad(old_log_probs), _pad(advantages)]
    if has_mask:
        m = action_mask
        if m.dtype == jnp.bool_:
            m = m.astype(jnp.int8)   # narrow dtype over HBM; cast to f32 in-kernel
        inputs.append(_pad(m))

    data_spec = pl.BlockSpec((TB, TS), lambda i, j: (i, j))
    in_specs = [data_spec] * len(inputs)

    out_shape = tuple(jax.ShapeDtypeStruct((nb, 8, 128), jnp.float32)
                      for _ in range(3))
    out_specs = tuple(pl.BlockSpec((1, 8, 128), lambda i, j: (i, 0, 0))
                      for _ in range(3))

    scratch = [pltpu.VMEM((TB, 1), jnp.float32)]              # row_num
    if has_mask:
        scratch.append(pltpu.VMEM((TB, 1), jnp.float32))      # row_den
    scratch += [pltpu.VMEM((TB, 1), jnp.float32),             # r_sum
                pltpu.VMEM((TB, 1), jnp.float32)]             # r_max

    kernel = functools.partial(_policy_loss_kernel, clip_eps=float(clip_eps),
                               B=B, S=S, has_mask=has_mask)

    n_elems = B_pad * S_pad
    in_bytes = sum(int(x.dtype.itemsize) * n_elems for x in inputs)
    cost = pl.CostEstimate(flops=12 * n_elems, transcendentals=n_elems,
                           bytes_accessed=in_bytes + 3 * nb * 8 * 128 * 4)

    loss_p, rsum_p, rmax_p = pl.pallas_call(
        kernel,
        out_shape=out_shape,
        grid_spec=pltpu.PrefetchScalarGridSpec(
            num_scalar_prefetch=0,
            grid=(nb, ns),
            in_specs=in_specs,
            out_specs=out_specs,
            scratch_shapes=scratch),
        compiler_params=pltpu.CompilerParams(
            dimension_semantics=("parallel", "arbitrary"),
            vmem_limit_bytes=32 * 1024 * 1024),
        cost_estimate=cost,
    )(*inputs)

    # Tiny final combine across batch blocks (lets v7x's 2 TCs emit partials).
    loss = jnp.sum(loss_p[:, 0, 0]) / B
    ratio_mean = jnp.sum(rsum_p[:, 0, 0]) / (B * S)
    ratio_max = jnp.max(rmax_p[:, 0, 0])
    skip = ratio_mean > skip_threshold
    return loss, skip, ratio_max


def _ref_policy_loss(log_probs, old_log_probs, advantages, action_mask=None,
                     clip_eps: float = 0.2, skip_threshold: float = 20.0):
    """Pure-JAX reference mirroring the PyTorch forward."""
    if action_mask is None:
        ratio_ = jnp.exp(log_probs - old_log_probs)
    else:
        ratio_ = jnp.exp((log_probs - old_log_probs) * action_mask)
    skip = ratio_.mean() > skip_threshold
    ratio = jnp.clip(ratio_, 0.0, 10.0)
    surr1 = ratio * advantages
    surr2 = jnp.clip(ratio, 1 - clip_eps, 1 + clip_eps) * advantages
    loss = -jnp.minimum(surr1, surr2)
    if action_mask is not None:
        m = action_mask.astype(loss.dtype)
        loss = (loss * m).sum(axis=1) / m.sum(axis=1)
    else:
        loss = loss.mean(axis=1)
    return loss.mean(), skip, ratio_.max()


if __name__ == "__main__":
    key = jax.random.PRNGKey(0)
    k1, k2, k3, k4 = jax.random.split(key, 4)

    B, S = 2, 8
    log_probs = jax.random.normal(k1, (B, S), dtype=jnp.float32) * 0.1 - 1.0
    old_log_probs = jax.random.normal(k2, (B, S), dtype=jnp.float32) * 0.1 - 1.0
    advantages = jax.random.normal(k3, (B, S), dtype=jnp.float32)
    action_mask_bool = jax.random.uniform(k4, (B, S)) > 0.3   # native bool mask
    action_mask_f32 = action_mask_bool.astype(jnp.float32)

    # Masked case (bool mask streamed as int8, cast in-kernel).
    loss, skip, rmax = policy_loss(log_probs, old_log_probs, advantages,
                                   action_mask_bool)
    jax.block_until_ready((loss, skip, rmax))
    rl, rs, rm = _ref_policy_loss(log_probs, old_log_probs, advantages,
                                  action_mask_f32)
    assert jnp.allclose(loss, rl, atol=1e-5), (loss, rl)
    assert bool(skip) == bool(rs)
    assert jnp.allclose(rmax, rm, atol=1e-5), (rmax, rm)

    # No-mask case (mask-free kernel variant; no ones-mask streamed).
    loss2, skip2, rmax2 = policy_loss(log_probs, old_log_probs, advantages, None)
    jax.block_until_ready((loss2, skip2, rmax2))
    rl2, rs2, rm2 = _ref_policy_loss(log_probs, old_log_probs, advantages, None)
    assert jnp.allclose(loss2, rl2, atol=1e-5), (loss2, rl2)
    assert bool(skip2) == bool(rs2)
    assert jnp.allclose(rmax2, rm2, atol=1e-5), (rmax2, rm2)

    # bf16 inputs (upcast in-register inside the kernel; reference in f32).
    lp_bf = log_probs.astype(jnp.bfloat16)
    olp_bf = old_log_probs.astype(jnp.bfloat16)
    adv_bf = advantages.astype(jnp.bfloat16)
    loss3, skip3, rmax3 = policy_loss(lp_bf, olp_bf, adv_bf, action_mask_bool)
    jax.block_until_ready((loss3, skip3, rmax3))
    rl3, rs3, rm3 = _ref_policy_loss(lp_bf.astype(jnp.float32),
                                     olp_bf.astype(jnp.float32),
                                     adv_bf.astype(jnp.float32),
                                     action_mask_f32)
    assert jnp.allclose(loss3, rl3, atol=1e-5), (loss3, rl3)
    assert bool(skip3) == bool(rs3)
    assert jnp.allclose(rmax3, rm3, atol=1e-5), (rmax3, rm3)

    print("KERNEL_OK")
</pallas_src>

<mosaic_0001>
module attributes {stable_mosaic.version = 11 : i64} {
  func.func @_policy_loss_kernel(%arg0: i32, %arg1: i32, %arg2: memref<32x128xf32, #tpu.memory_space<vmem>>, %arg3: memref<32x128xf32, #tpu.memory_space<vmem>>, %arg4: memref<32x128xf32, #tpu.memory_space<vmem>>, %arg5: memref<32x128xi8, #tpu.memory_space<vmem>>, %arg6: memref<1x8x128xf32, #tpu.memory_space<vmem>>, %arg7: memref<1x8x128xf32, #tpu.memory_space<vmem>>, %arg8: memref<1x8x128xf32, #tpu.memory_space<vmem>>, %arg9: memref<32x1xf32, #tpu.memory_space<vmem>>, %arg10: memref<32x1xf32, #tpu.memory_space<vmem>>, %arg11: memref<32x1xf32, #tpu.memory_space<vmem>>, %arg12: memref<32x1xf32, #tpu.memory_space<vmem>>) attributes {dimension_semantics = [#tpu.dimension_semantics<parallel>, #tpu.dimension_semantics<arbitrary>], iteration_bounds = array<i64: 1, 1>, scalar_prefetch = 0 : i64, scratch_operands = 4 : i64, tpu.core_type = #tpu.core_type<tc>, window_params = [{transform_indices = @transform_0, window_bounds = array<i64: 32, 128>}, {transform_indices = @transform_1, window_bounds = array<i64: 32, 128>}, {transform_indices = @transform_2, window_bounds = array<i64: 32, 128>}, {transform_indices = @transform_3, window_bounds = array<i64: 32, 128>}, {transform_indices = @transform_4, window_bounds = array<i64: 1, 8, 128>}, {transform_indices = @transform_5, window_bounds = array<i64: 1, 8, 128>}, {transform_indices = @transform_6, window_bounds = array<i64: 1, 8, 128>}]} {
    %c0_i32 = arith.constant 0 : i32
    %0 = arith.cmpi eq, %arg1, %c0_i32 : i32
    %1 = arith.extui %0 : i1 to i32
    %c0_i32_0 = arith.constant 0 : i32
    %2 = arith.cmpi ne, %1, %c0_i32_0 : i32
    scf.if %2 {
      %cst_36 = arith.constant 0.000000e+00 : f32
      %65 = vector.broadcast %cst_36 : f32 to vector<32x1xf32>
      %c0_37 = arith.constant 0 : index
      %c0_38 = arith.constant 0 : index
      %66 = vector.load %arg9[%c0_37, %c0_38] : memref<32x1xf32, #tpu.memory_space<vmem>>, vector<32x1xf32>
      tpu.vector_store %arg9[%c0_37, %c0_38], %65 {strides = array<i32>} : memref<32x1xf32, #tpu.memory_space<vmem>>, vector<32x1xf32>,
      %cst_39 = arith.constant 0.000000e+00 : f32
      %67 = vector.broadcast %cst_39 : f32 to vector<32x1xf32>
      %c0_40 = arith.constant 0 : index
      %c0_41 = arith.constant 0 : index
      %68 = vector.load %arg11[%c0_40, %c0_41] : memref<32x1xf32, #tpu.memory_space<vmem>>, vector<32x1xf32>
      tpu.vector_store %arg11[%c0_40, %c0_41], %67 {strides = array<i32>} : memref<32x1xf32, #tpu.memory_space<vmem>>, vector<32x1xf32>,
      %cst_42 = arith.constant 0xFF800000 : f32
      %69 = vector.broadcast %cst_42 : f32 to vector<32x1xf32>
      %c0_43 = arith.constant 0 : index
      %c0_44 = arith.constant 0 : index
      %70 = vector.load %arg12[%c0_43, %c0_44] : memref<32x1xf32, #tpu.memory_space<vmem>>, vector<32x1xf32>
      tpu.vector_store %arg12[%c0_43, %c0_44], %69 {strides = array<i32>} : memref<32x1xf32, #tpu.memory_space<vmem>>, vector<32x1xf32>,
      %cst_45 = arith.constant 0.000000e+00 : f32
      %71 = vector.broadcast %cst_45 : f32 to vector<32x1xf32>
      %c0_46 = arith.constant 0 : index
      %c0_47 = arith.constant 0 : index
      %72 = vector.load %arg10[%c0_46, %c0_47] : memref<32x1xf32, #tpu.memory_space<vmem>>, vector<32x1xf32>
      tpu.vector_store %arg10[%c0_46, %c0_47], %71 {strides = array<i32>} : memref<32x1xf32, #tpu.memory_space<vmem>>, vector<32x1xf32>,
    } else {
    }
    %c0 = arith.constant 0 : index
    %c0_1 = arith.constant 0 : index
    %3 = vector.load %arg2[%c0, %c0_1] : memref<32x128xf32, #tpu.memory_space<vmem>>, vector<32x128xf32>
    %c0_2 = arith.constant 0 : index
    %c0_3 = arith.constant 0 : index
    %4 = vector.load %arg3[%c0_2, %c0_3] : memref<32x128xf32, #tpu.memory_space<vmem>>, vector<32x128xf32>
    %c0_4 = arith.constant 0 : index
    %c0_5 = arith.constant 0 : index
    %5 = vector.load %arg4[%c0_4, %c0_5] : memref<32x128xf32, #tpu.memory_space<vmem>>, vector<32x128xf32>
    %6 = arith.subf %3, %4 : vector<32x128xf32>
    %c0_6 = arith.constant 0 : index
    %c0_7 = arith.constant 0 : index
    %7 = vector.load %arg5[%c0_6, %c0_7] : memref<32x128xi8, #tpu.memory_space<vmem>>, vector<32x128xi8>
    %8 = arith.sitofp %7 : vector<32x128xi8> to vector<32x128xf32>
    %9 = arith.mulf %6, %8 : vector<32x128xf32>
    %10 = math.exp %9 : vector<32x128xf32>
    %c32_i32 = arith.constant 32 : i32
    %11 = arith.muli %arg0, %c32_i32 : i32
    %12 = tpu.iota {dimensions = array<i32: 0>} : vector<32x128xi32>
    %13 = vector.broadcast %11 : i32 to vector<32x128xi32>
    %14 = arith.addi %13, %12 : vector<32x128xi32>
    %c128_i32 = arith.constant 128 : i32
    %15 = arith.muli %arg1, %c128_i32 : i32
    %16 = tpu.iota {dimensions = array<i32: 1>} : vector<32x128xi32>
    %17 = vector.broadcast %15 : i32 to vector<32x128xi32>
    %18 = arith.addi %17, %16 : vector<32x128xi32>
    %c2_i32 = arith.constant 2 : i32
    %19 = vector.broadcast %c2_i32 : i32 to vector<32x128xi32>
    %20 = arith.cmpi slt, %14, %19 : vector<32x128xi32>
    %c8_i32 = arith.constant 8 : i32
    %21 = vector.broadcast %c8_i32 : i32 to vector<32x128xi32>
    %22 = arith.cmpi slt, %18, %21 : vector<32x128xi32>
    %23 = arith.andi %20, %22 : vector<32x128xi1>
    %cst = arith.constant 0.000000e+00 : f32
    %24 = vector.broadcast %cst : f32 to vector<32x128xf32>
    %25 = arith.select %23, %10, %24 : vector<32x128xi1>, vector<32x128xf32>
    %cst_8 = arith.constant 0xFF800000 : f32
    %26 = vector.broadcast %cst_8 : f32 to vector<32x128xf32>
    %27 = arith.select %23, %10, %26 : vector<32x128xi1>, vector<32x128xf32>
    %cst_9 = arith.constant 0.000000e+00 : f32
    %cst_10 = arith.constant 1.000000e+01 : f32
    %28 = vector.broadcast %cst_9 : f32 to vector<32x128xf32>
    %29 = arith.maximumf %28, %10 : vector<32x128xf32>
    %30 = vector.broadcast %cst_10 : f32 to vector<32x128xf32>
    %31 = arith.minimumf %30, %29 : vector<32x128xf32>
    %32 = arith.mulf %31, %5 : vector<32x128xf32>
    %cst_11 = arith.constant 8.000000e-01 : f32
    %cst_12 = arith.constant 1.200000e+00 : f32
    %33 = vector.broadcast %cst_11 : f32 to vector<32x128xf32>
    %34 = arith.maximumf %33, %31 : vector<32x128xf32>
    %35 = vector.broadcast %cst_12 : f32 to vector<32x128xf32>
    %36 = arith.minimumf %35, %34 : vector<32x128xf32>
    %37 = arith.mulf %36, %5 : vector<32x128xf32>
    %38 = arith.minimumf %32, %37 : vector<32x128xf32>
    %cst_13 = arith.constant 0.000000e+00 : f32
    %39 = vector.broadcast %cst_13 : f32 to vector<32x128xf32>
    %40 = arith.subf %39, %38 : vector<32x128xf32>
    %41 = arith.mulf %40, %8 : vector<32x128xf32>
    %c0_14 = arith.constant 0 : index
    %c0_15 = arith.constant 0 : index
    %42 = vector.load %arg10[%c0_14, %c0_15] : memref<32x1xf32, #tpu.memory_space<vmem>>, vector<32x1xf32>
    %cst_16 = arith.constant dense<0.000000e+00> : vector<32xf32>
    %43 = vector.multi_reduction <add>, %8, %cst_16 [1] : vector<32x128xf32> to vector<32xf32>
    %44 = vector.shape_cast %43 : vector<32xf32> to vector<32x1xf32>
    %45 = arith.addf %42, %44 : vector<32x1xf32>
    %c0_17 = arith.constant 0 : index
    %c0_18 = arith.constant 0 : index
    %46 = vector.load %arg10[%c0_17, %c0_18] : memref<32x1xf32, #tpu.memory_space<vmem>>, vector<32x1xf32>
    tpu.vector_store %arg10[%c0_17, %c0_18], %45 {strides = array<i32>} : memref<32x1xf32, #tpu.memory_space<vmem>>, vector<32x1xf32>,
    %c0_19 = arith.constant 0 : index
    %c0_20 = arith.constant 0 : index
    %47 = vector.load %arg9[%c0_19, %c0_20] : memref<32x1xf32, #tpu.memory_space<vmem>>, vector<32x1xf32>
    %cst_21 = arith.constant dense<0.000000e+00> : vector<32xf32>
    %48 = vector.multi_reduction <add>, %41, %cst_21 [1] : vector<32x128xf32> to vector<32xf32>
    %49 = vector.shape_cast %48 : vector<32xf32> to vector<32x1xf32>
    %50 = arith.addf %47, %49 : vector<32x1xf32>
    %c0_22 = arith.constant 0 : index
    %c0_23 = arith.constant 0 : index
    %51 = vector.load %arg9[%c0_22, %c0_23] : memref<32x1xf32, #tpu.memory_space<vmem>>, vector<32x1xf32>
    tpu.vector_store %arg9[%c0_22, %c0_23], %50 {strides = array<i32>} : memref<32x1xf32, #tpu.memory_space<vmem>>, vector<32x1xf32>,
    %c0_24 = arith.constant 0 : index
    %c0_25 = arith.constant 0 : index
    %52 = vector.load %arg11[%c0_24, %c0_25] : memref<32x1xf32, #tpu.memory_space<vmem>>, vector<32x1xf32>
    %cst_26 = arith.constant dense<0.000000e+00> : vector<32xf32>
    %53 = vector.multi_reduction <add>, %25, %cst_26 [1] : vector<32x128xf32> to vector<32xf32>
    %54 = vector.shape_cast %53 : vector<32xf32> to vector<32x1xf32>
    %55 = arith.addf %52, %54 : vector<32x1xf32>
    %c0_27 = arith.constant 0 : index
    %c0_28 = arith.constant 0 : index
    %56 = vector.load %arg11[%c0_27, %c0_28] : memref<32x1xf32, #tpu.memory_space<vmem>>, vector<32x1xf32>
    tpu.vector_store %arg11[%c0_27, %c0_28], %55 {strides = array<i32>} : memref<32x1xf32, #tpu.memory_space<vmem>>, vector<32x1xf32>,
    %c0_29 = arith.constant 0 : index
    %c0_30 = arith.constant 0 : index
    %57 = vector.load %arg12[%c0_29, %c0_30] : memref<32x1xf32, #tpu.memory_space<vmem>>, vector<32x1xf32>
    %cst_31 = arith.constant dense<0xFF800000> : vector<32xf32>
    %58 = vector.multi_reduction <maximumf>, %27, %cst_31 [1] : vector<32x128xf32> to vector<32xf32>
    %59 = vector.shape_cast %58 : vector<32xf32> to vector<32x1xf32>
    %60 = arith.maximumf %57, %59 : vector<32x1xf32>
    %c0_32 = arith.constant 0 : index
    %c0_33 = arith.constant 0 : index
    %61 = vector.load %arg12[%c0_32, %c0_33] : memref<32x1xf32, #tpu.memory_space<vmem>>, vector<32x1xf32>
    tpu.vector_store %arg12[%c0_32, %c0_33], %60 {strides = array<i32>} : memref<32x1xf32, #tpu.memory_space<vmem>>, vector<32x1xf32>,
    %c0_i32_34 = arith.constant 0 : i32
    %62 = arith.cmpi eq, %arg1, %c0_i32_34 : i32
    %63 = arith.extui %62 : i1 to i32
    %c0_i32_35 = arith.constant 0 : i32
    %64 = arith.cmpi ne, %63, %c0_i32_35 : i32
    scf.if %64 {
      %c0_36 = arith.constant 0 : index
      %c0_37 = arith.constant 0 : index
      %65 = vector.load %arg9[%c0_36, %c0_37] : memref<32x1xf32, #tpu.memory_space<vmem>>, vector<32x1xf32>
      %c0_38 = arith.constant 0 : index
      %c0_39 = arith.constant 0 : index
      %66 = vector.load %arg10[%c0_38, %c0_39] : memref<32x1xf32, #tpu.memory_space<vmem>>, vector<32x1xf32>
      %67 = arith.divf %65, %66 : vector<32x1xf32>
      %68 = vector.extract_strided_slice %14 {offsets = [0, 0], sizes = [32, 1], strides = [1, 1]} : vector<32x128xi32> to vector<32x1xi32>
      %c2_i32_40 = arith.constant 2 : i32
      %69 = vector.broadcast %c2_i32_40 : i32 to vector<32x1xi32>
      %70 = arith.cmpi slt, %68, %69 : vector<32x1xi32>
      %cst_41 = arith.constant 0.000000e+00 : f32
      %71 = vector.broadcast %cst_41 : f32 to vector<32x1xf32>
      %72 = arith.select %70, %67, %71 : vector<32x1xi1>, vector<32x1xf32>
      %73 = vector.shape_cast %72 : vector<32x1xf32> to vector<1x32x1xf32>
      %cst_42 = arith.constant dense<0.000000e+00> : vector<1xf32>
      %74 = vector.multi_reduction <add>, %73, %cst_42 [1, 2] : vector<1x32x1xf32> to vector<1xf32>
      %75 = vector.shape_cast %74 : vector<1xf32> to vector<1x1x1xf32>
      %76 = vector.extract %75[0, 0, 0] : f32 from vector<1x1x1xf32>
      %c0_43 = arith.constant 0 : index
      %c0_44 = arith.constant 0 : index
      %77 = vector.load %arg11[%c0_43, %c0_44] : memref<32x1xf32, #tpu.memory_space<vmem>>, vector<32x1xf32>
      %78 = vector.shape_cast %77 : vector<32x1xf32> to vector<1x32x1xf32>
      %cst_45 = arith.constant dense<0.000000e+00> : vector<1xf32>
      %79 = vector.multi_reduction <add>, %78, %cst_45 [1, 2] : vector<1x32x1xf32> to vector<1xf32>
      %80 = vector.shape_cast %79 : vector<1xf32> to vector<1x1x1xf32>
      %81 = vector.extract %80[0, 0, 0] : f32 from vector<1x1x1xf32>
      %c0_46 = arith.constant 0 : index
      %c0_47 = arith.constant 0 : index
      %82 = vector.load %arg12[%c0_46, %c0_47] : memref<32x1xf32, #tpu.memory_space<vmem>>, vector<32x1xf32>
      %83 = vector.shape_cast %82 : vector<32x1xf32> to vector<1x32x1xf32>
      %cst_48 = arith.constant dense<0xFF800000> : vector<1xf32>
      %84 = vector.multi_reduction <maximumf>, %83, %cst_48 [1, 2] : vector<1x32x1xf32> to vector<1xf32>
      %85 = vector.shape_cast %84 : vector<1xf32> to vector<1x1x1xf32>
      %86 = vector.extract %85[0, 0, 0] : f32 from vector<1x1x1xf32>
      %87 = vector.broadcast %76 : f32 to vector<1x8x128xf32>
      %c0_49 = arith.constant 0 : index
      %c0_50 = arith.constant 0 : index
      %c0_51 = arith.constant 0 : index
      %88 = vector.load %arg6[%c0_49, %c0_50, %c0_51] : memref<1x8x128xf32, #tpu.memory_space<vmem>>, vector<1x8x128xf32>
      tpu.vector_store %arg6[%c0_49, %c0_50, %c0_51], %87 {strides = array<i32>} : memref<1x8x128xf32, #tpu.memory_space<vmem>>, vector<1x8x128xf32>,
      %89 = vector.broadcast %81 : f32 to vector<1x8x128xf32>
      %c0_52 = arith.constant 0 : index
      %c0_53 = arith.constant 0 : index
      %c0_54 = arith.constant 0 : index
      %90 = vector.load %arg7[%c0_52, %c0_53, %c0_54] : memref<1x8x128xf32, #tpu.memory_space<vmem>>, vector<1x8x128xf32>
      tpu.vector_store %arg7[%c0_52, %c0_53, %c0_54], %89 {strides = array<i32>} : memref<1x8x128xf32, #tpu.memory_space<vmem>>, vector<1x8x128xf32>,
      %91 = vector.broadcast %86 : f32 to vector<1x8x128xf32>
      %c0_55 = arith.constant 0 : index
      %c0_56 = arith.constant 0 : index
      %c0_57 = arith.constant 0 : index
      %92 = vector.load %arg8[%c0_55, %c0_56, %c0_57] : memref<1x8x128xf32, #tpu.memory_space<vmem>>, vector<1x8x128xf32>
      tpu.vector_store %arg8[%c0_55, %c0_56, %c0_57], %91 {strides = array<i32>} : memref<1x8x128xf32, #tpu.memory_space<vmem>>, vector<1x8x128xf32>,
    } else {
    }
    return
  }
  func.func @transform_0(%arg0: i32, %arg1: i32) -> (i32, i32) {
    %c0_i32 = arith.constant 0 : i32
    return %arg0, %arg1 : i32, i32
  }
  func.func @transform_1(%arg0: i32, %arg1: i32) -> (i32, i32) {
    %c0_i32 = arith.constant 0 : i32
    return %arg0, %arg1 : i32, i32
  }
  func.func @transform_2(%arg0: i32, %arg1: i32) -> (i32, i32) {
    %c0_i32 = arith.constant 0 : i32
    return %arg0, %arg1 : i32, i32
  }
  func.func @transform_3(%arg0: i32, %arg1: i32) -> (i32, i32) {
    %c0_i32 = arith.constant 0 : i32
    return %arg0, %arg1 : i32, i32
  }
  func.func @transform_4(%arg0: i32, %arg1: i32) -> (i32, i32, i32) {
    %c0_i32 = arith.constant 0 : i32
    %c0_i32_0 = arith.constant 0 : i32
    %c0_i32_1 = arith.constant 0 : i32
    return %arg0, %c0_i32, %c0_i32_0 : i32, i32, i32
  }
  func.func @transform_5(%arg0: i32, %arg1: i32) -> (i32, i32, i32) {
    %c0_i32 = arith.constant 0 : i32
    %c0_i32_0 = arith.constant 0 : i32
    %c0_i32_1 = arith.constant 0 : i32
    return %arg0, %c0_i32, %c0_i32_0 : i32, i32, i32
  }
  func.func @transform_6(%arg0: i32, %arg1: i32) -> (i32, i32, i32) {
    %c0_i32 = arith.constant 0 : i32
    %c0_i32_0 = arith.constant 0 : i32
    %c0_i32_1 = arith.constant 0 : i32
    return %arg0, %c0_i32, %c0_i32_0 : i32, i32, i32
  }
}

</mosaic_0001>

<bundles_post_ra>
// kernel: tpu_custom_call.1
= control target key start
LH: loop header
LB: loop body
LE: loop exit
PB: predicated region body
PF: predicated region fallthrough
CT: control target
= control target key end

     0   :  { %12 = vsyncpa [#allocation7], 0  ;;  %s777_s0 = inlined_call_operand.hbm [shape: f32[32,128], index: 0, kind: input, shape index: {}]   ;;  %s778_s1 = inlined_call_operand.hbm [shape: f32[32,128], index: 1, kind: input, shape index: {}]   ;;  %s779_s2 = inlined_call_operand.hbm [shape: f32[32,128], index: 2, kind: input, shape index: {}]   ;;  %s780_s3 = inlined_call_operand.vmem [shape: s8[32,128], index: 3, kind: input, shape index: {}]   ;;  %s781_s4 = inlined_call_operand.hbm [shape: f32[1,8,128], index: 4, kind: output, shape index: {0}]   ;;  %s782_s5 = inlined_call_operand.hbm [shape: f32[1,8,128], index: 5, kind: output, shape index: {1}]   ;;  %s783_s6 = inlined_call_operand.hbm [shape: f32[1,8,128], index: 6, kind: output, shape index: {2}]  }
   0x1   :  { %13 = vsyncpa [#allocation10], 0 }
   0x2   :  { %14 = vsyncpa [#allocation8], 0 }
   0x3   :  { %15 = vsyncpa [#allocation14], 0  ;;  %s565_s21 = smov [#allocation9]   ;;  %s566_s23 = smov [#allocation6]  }
   0x4   :  { %s33_s22 = sshll.u32 %s565_s21, 4  ;;  %s21_s24 = sshll.u32 %s566_s23, 4  ;;  %s34_s22 = int_to_ptr.vmem [resolvable:$true] %s33_s22  ;;  %s610_s24 = int_to_ptr.vmem [resolvable:$true] %s21_s24 }
   0x5   :  { %s425_s27 = scalar_lea.hbm %s778_s1, 512 }
   0x6   :  { %p426_p0 = scmp.ne.s32.totalorder %s778_s1, %s425_s27  ;;  %p429_p1 = scmp.lt.u32.totalorder %s425_s27, %s778_s1 }
   0x8   :  { %p431_p2 = pnand %p429_p1, %p426_p0 }
   0xa   :  { %434 = shalt.err (!%p431_p2)
}
   0xb   :  { %s435_s8 = scalar_lea.vmem %s34_s22, 512  ;;  %p440_p4 = scmp.lt.s32.totalorder %s34_s22, %s34_s22 }
   0xc   :  { %p436_p3 = scmp.ne.s32.totalorder %s34_s22, %s435_s8  ;;  %p441_p5 = scmp.lt.s32.totalorder %s435_s8, %s435_s8 }
   0xe   :  { %p442_p6 = por %p441_p5, %p440_p4 }
  0x10   :  { %p443_p7 = pnand %p442_p6, %p436_p3 }
  0x12   :  { %446 = shalt.err (!%p443_p7)
}
  0x13   :  { %s567_s9 = smov 128   ;;  %s568_s10 = smov 8  }
  0x14   :  { %39 = dma.hbm_to_vmem [thread:$0]  %s778_s1, 512, %s34_s22, [#allocation10], %s567_s9, %s567_s9, %s568_s10  }
  0x15   :  { %s447_s15 = scalar_lea.hbm %s777_s0, 512 }
  0x16   :  { %p448_p8 = scmp.ne.s32.totalorder %s777_s0, %s447_s15  ;;  %p451_p9 = scmp.lt.u32.totalorder %s447_s15, %s777_s0 }
  0x18   :  { %p453_p10 = pnand %p451_p9, %p448_p8 }
  0x1a   :  { %456 = shalt.err (!%p453_p10)
}
  0x1b   :  { %s457_s20 = scalar_lea.vmem %s610_s24, 512  ;;  %p462_p12 = scmp.lt.s32.totalorder %s610_s24, %s610_s24 }
  0x1c   :  { %p458_p11 = scmp.ne.s32.totalorder %s610_s24, %s457_s20  ;;  %p463_p13 = scmp.lt.s32.totalorder %s457_s20, %s457_s20 }
  0x1e   :  { %p464_p0 = por %p463_p13, %p462_p12 }
  0x20   :  { %p465_p1 = pnand %p464_p0, %p458_p11 }
  0x22   :  { %468 = shalt.err (!%p465_p1)
}
  0x23   :  { %27 = dma.hbm_to_vmem [thread:$0]  %s777_s0, 512, %s610_s24, [#allocation7], %s567_s9, %s567_s9, %s568_s10  }
  0x24   :  { %s569_s22 = smov [#allocation11]   ;;  %s469_s27 = scalar_lea.hbm %s779_s2, 512 }
  0x25   :  { %s45_s23 = sshll.u32 %s569_s22, 4  ;;  %p470_p2 = scmp.ne.s32.totalorder %s779_s2, %s469_s27  ;;  %s46_s23 = int_to_ptr.vmem [resolvable:$true] %s45_s23 }
  0x26   :  { %p473_p3 = scmp.lt.u32.totalorder %s469_s27, %s779_s2 }
  0x28   :  { %p475_p4 = pnand %p473_p3, %p470_p2 }
  0x2a   :  { %478 = shalt.err (!%p475_p4)
}
  0x2b   :  { %s479_s8 = scalar_lea.vmem %s46_s23, 512  ;;  %p484_p6 = scmp.lt.s32.totalorder %s46_s23, %s46_s23 }
  0x2c   :  { %p480_p5 = scmp.ne.s32.totalorder %s46_s23, %s479_s8  ;;  %p485_p7 = scmp.lt.s32.totalorder %s479_s8, %s479_s8 }
  0x2e   :  { %p486_p8 = por %p485_p7, %p484_p6 }
  0x30   :  { %p487_p9 = pnand %p486_p8, %p480_p5 }
  0x32   :  { %490 = shalt.err (!%p487_p9)
}
  0x33   :  { %51 = dma.hbm_to_vmem [thread:$0]  %s779_s2, 512, %s46_s23, [#allocation10], %s567_s9, %s567_s9, %s568_s10  }
  0x34   :  { %557 = dma.done.wait [#allocation7], 512  }
  0x35   :  { %558 = vsyncadd [#allocation7], 4294966784 }
  0x36   :  { %559 = dma.done.wait [#allocation10], 1024  }
  0x37   :  { %560 = vsyncadd [#allocation10], 4294966272  ;;  %v570_v0 = vmov 0.0   ;;  %v571_v1 = vmov -inf   ;;  %v665_v2 = vld [vmem:[%s780_s3] sm:$0xff]  ;;  %v122_v9 = vlaneseq  ;;  %vm67_vm0 = vcmask 7168  }
  0x38   :  { %237 = vadd.xlane.f32.xlu1 %v570_v0  ;;  %257 = vmax.xlane.f32.xlu0 %v571_v1  ;;  %v84_v3 = vld [vmem:[#allocation6] sm:$0xff]  ;;  %v101_v5 = vunpack.c.0.s8 %v665_v2  ;;  %73 = vst.msk [vmem:[#allocation4 + $0x8] sm:$0xff] %vm67_vm0, %v570_v0  ;;  %68 = vst.msk [vmem:[#allocation2] sm:$0xff] %vm67_vm0, %v570_v0  ;;  %v103_v26 = vunpack.c.2.s8 %v665_v2  ;;  %v86_v27 = vld [vmem:[#allocation6 + $0x10] sm:$0xff]  ;;  %v102_v46 = vunpack.c.1.s8 %v665_v2  ;;  %v104_v53 = vunpack.c.3.s8 %v665_v2  ;;  %s572_s2 = smov [#allocation12]   ;;  %s573_s9 = smov [#allocation13]  }
  0x39   :  { %v88_v4 = vld [vmem:[#allocation9] sm:$0xff]  ;;  %69 = vst.msk [vmem:[#allocation2 + $0x8] sm:$0xff] %vm67_vm0, %v570_v0  ;;  %70 = vst.msk [vmem:[#allocation2 + $0x10] sm:$0xff] %vm67_vm0, %v570_v0  ;;  %v684_v11 = vshrl.u32 %v122_v9, 7  ;;  %v134_v12 = vand.u32 127, %v122_v9  ;;  %v90_v28 = vld [vmem:[#allocation9 + $0x10] sm:$0xff] }
  0x3a   :  { %v96_v6 = vsub.f32 %v84_v3, %v88_v4  ;;  %v105_v7 = vcvt.s32.f32 %v101_v5  ;;  %71 = vst.msk [vmem:[#allocation2 + $0x18] sm:$0xff] %vm67_vm0, %v570_v0  ;;  %72 = vst.msk [vmem:[#allocation4] sm:$0xff] %vm67_vm0, %v570_v0  ;;  %v92_v18 = vld [vmem:[#allocation11] sm:$0xff]  ;;  %v98_v33 = vsub.f32 %v86_v27, %v90_v28  ;;  %v690_v34 = vcvt.s32.f32 %v103_v26  ;;  %v85_v47 = vld [vmem:[#allocation6 + $0x8] sm:$0xff]  ;;  %s362_s3 = sshll.u32 %s572_s2, 4  ;;  %s372_s10 = sshll.u32 %s573_s9, 4  ;;  %s363_s3 = int_to_ptr.vmem [resolvable:$true] %s362_s3  ;;  %s734_s10 = int_to_ptr.vmem [resolvable:$true] %s372_s10 }
  0x3b   :  { %74 = vst.msk [vmem:[#allocation4 + $0x10] sm:$0xff] %vm67_vm0, %v570_v0  ;;  %75 = vst.msk [vmem:[#allocation4 + $0x18] sm:$0xff] %vm67_vm0, %v570_v0  ;;  %vm137_vm1 = vcmp.lt.s32.totalorder %v684_v11, 2  ;;  %vm141_vm2 = vcmp.lt.s32.totalorder %v134_v12, 8  ;;  %v89_v48 = vld [vmem:[#allocation9 + $0x8] sm:$0xff]  ;;  %v698_v52 = vcvt.s32.f32 %v102_v46  ;;  %v87_v54 = vld [vmem:[#allocation6 + $0x18] sm:$0xff]  ;;  %v703_v58 = vcvt.s32.f32 %v104_v53  ;;  %p496_p11 = scmp.lt.s32.totalorder %s363_s3, %s363_s3 }
  0x3c   :  { %239 = vadd.xlane.f32.xlu1 %v570_v0  ;;  %194 = vadd.xlane.f32.xlu0 %v105_v7  ;;  %v109_v8 = vmul.f32 %v105_v7, %v96_v6  ;;  %76 = vst.msk [vmem:[#allocation5] sm:$0xff] %vm67_vm0, %v571_v1  ;;  %77 = vst.msk [vmem:[#allocation5 + $0x8] sm:$0xff] %vm67_vm0, %v571_v1  ;;  %v111_v39 = vmul.f32 %v690_v34, %v98_v33  ;;  %v91_v55 = vld [vmem:[#allocation9 + $0x18] sm:$0xff]  ;;  %s574_s15 = smov [#allocation15]   ;;  %s491_s17 = scalar_lea.vmem %s363_s3, 128 }
  0x3d   :  { %78 = vst.msk [vmem:[#allocation5 + $0x10] sm:$0xff] %vm67_vm0, %v571_v1  ;;  %79 = vst.msk [vmem:[#allocation5 + $0x18] sm:$0xff] %vm67_vm0, %v571_v1  ;;  %v97_v51 = vsub.f32 %v85_v47, %v89_v48  ;;  %v99_v57 = vsub.f32 %v87_v54, %v91_v55  ;;  %v93_v47 = vld [vmem:[#allocation11 + $0x8] sm:$0xff]  ;;  %s382_s16 = sshll.u32 %s574_s15, 4  ;;  %p492_p10 = scmp.ne.s32.totalorder %s363_s3, %s491_s17  ;;  %s383_s16 = int_to_ptr.vmem [resolvable:$true] %s382_s16 }
  0x3e   :  { %v113_v10 = vmul.f32 1.442695, %v109_v8  ;;  %80 = vst.msk [vmem:[#allocation3] sm:$0xff] %vm67_vm0, %v570_v0  ;;  %81 = vst.msk [vmem:[#allocation3 + $0x8] sm:$0xff] %vm67_vm0, %v570_v0  ;;  %v117_v43 = vmul.f32 1.442695, %v111_v39  ;;  %p497_p12 = scmp.lt.s32.totalorder %s491_s17, %s491_s17 }
  0x3f   :  { %82 = vst.msk [vmem:[#allocation3 + $0x10] sm:$0xff] %vm67_vm0, %v570_v0  ;;  %83 = vst.msk [vmem:[#allocation3 + $0x18] sm:$0xff] %vm67_vm0, %v570_v0  ;;  %v232_v29 = vld [vmem:[#allocation4 + $0x8] sm:$0xff]  ;;  %v110_v56 = vmul.f32 %v698_v52, %v97_v51  ;;  %v112_v60 = vmul.f32 %v703_v58, %v99_v57  ;;  %v95_v57 = vld [vmem:[#allocation11 + $0x18] sm:$0xff] }
  0x40   :  { %259 = vmax.xlane.f32.xlu1 %v571_v1  ;;  %415 = vpow2.f32 %v113_v10  ;;  %vm142_vm3 = vmand %vm137_vm1, %vm141_vm2  ;;  %p498_p13 = por %p497_p12, %p496_p11 }
  0x41   :  { %417 = vpow2.f32 %v117_v43  ;;  %v115_v59 = vmul.f32 1.442695, %v110_v56  ;;  %v231_v63 = vld [vmem:[#allocation4] sm:$0xff] }
  0x42   :  { %v233_v37 = vld [vmem:[#allocation4 + $0x10] sm:$0xff]  ;;  %v234_v6 = vld [vmem:[#allocation4 + $0x18] sm:$0xff]  ;;  %p499_p0 = pnand %p498_p13, %p492_p10 }
  0x43   :  { %v252_v30 = vld [vmem:[#allocation5 + $0x8] sm:$0xff]  ;;  %v251_v62 = vld [vmem:[#allocation5] sm:$0xff]  ;;  %419 = vpow2.f32 %v115_v59 }
  0x44   :  { %v253_v41 = vld [vmem:[#allocation5 + $0x10] sm:$0xff] }
  0x45   :  { %v190_v45 = vld [vmem:[#allocation3] sm:$0xff] }
  0x4a   :  { %v416_v13 = vpop.eup %415 }
  0x4b   :  { %v150_v14 = vsel %vm142_vm3, %v416_v13, -inf  ;;  %v146_v15 = vsel %vm142_vm3, %v416_v13, 0.0  ;;  %v154_v16 = vmax.f32 %v416_v13, 0.0  ;;  %v418_v61 = vpop.eup %417 }
  0x4c   :  { %255 = vmax.xlane.f32.xlu1 %v150_v14  ;;  %235 = vadd.xlane.f32.xlu0 %v146_v15 }
  0x4d   :  { %v158_v17 = vmin.f32 %v154_v16, 10.0  ;;  %v420_v13 = vpop.eup %419 }
  0x4f   :  { %v166_v19 = vmax.f32 %v158_v17, 0.8  ;;  %v162_v20 = vmul.f32 %v158_v17, %v92_v18 }
  0x50   :  { %241 = vadd.xlane.f32.xlu1 %v570_v0  ;;  %v119_v0 = vmul.f32 1.442695, %v112_v60 }
  0x51   :  { %v170_v21 = vmin.f32 %v166_v19, 1.2 }
  0x52   :  { %421 = vpow2.f32 %v119_v0 }
  0x53   :  { %v174_v22 = vmul.f32 %v170_v21, %v92_v18  ;;  %v155_v21 = vmax.f32 %v420_v13, 0.0 }
  0x55   :  { %v178_v23 = vmin.f32 %v162_v20, %v174_v22  ;;  %v94_v22 = vld [vmem:[#allocation11 + $0x10] sm:$0xff] }
  0x57   :  { %v182_v24 = vsub.f32 0.0, %v178_v23 }
  0x59   :  { %v186_v25 = vmul.f32 %v182_v24, %v105_v7 }
  0x5b   :  { %215 = vadd.xlane.f32.xlu0 %v186_v25  ;;  %v211_v25 = vld [vmem:[#allocation2] sm:$0xff] }
  0x5c   :  { %v422_v23 = vpop.eup %421 }
  0x5d   :  { %v157_v33 = vmax.f32 %v422_v23, 0.0  ;;  %v213_v23 = vld [vmem:[#allocation2 + $0x10] sm:$0xff] }
  0x5f   :  { %261 = vmax.xlane.f32.xlu0 %v571_v1  ;;  %v156_v1 = vmax.f32 %v418_v61, 0.0 }
  0x61   :  { %v160_v7 = vmin.f32 %v156_v1, 10.0 }
  0x63   :  { %v168_v12 = vmax.f32 %v160_v7, 0.8  ;;  %v164_v28 = vmul.f32 %v160_v7, %v94_v22 }
  0x65   :  { %v172_v18 = vmin.f32 %v168_v12, 1.2 }
  0xc5   :  { %v238_v31 = vpop.xlane.xlu1 %237  ;;  %v258_v32 = vpop.xlane.xlu0 %257 }
  0xc6   :  { %v244_v35 = vadd.f32 %v238_v31, %v232_v29  ;;  %v264_v36 = vmax.f32 %v252_v30, %v258_v32  ;;  %v176_v29 = vmul.f32 %v172_v18, %v94_v22  ;;  %v159_v32 = vmin.f32 %v155_v21, 10.0 }
  0xc8   :  { %248 = vst.msk [vmem:[#allocation4 + $0x8] sm:$0xff] %vm67_vm0, %v244_v35  ;;  %268 = vst.msk [vmem:[#allocation5 + $0x8] sm:$0xff] %vm67_vm0, %v264_v36  ;;  %v163_v55 = vmul.f32 %v159_v32, %v93_v47 }
  0xc9   :  { %v240_v38 = vpop.xlane.xlu1 %239  ;;  %v195_v49 = vpop.xlane.xlu0 %194 }
  0xca   :  { %v245_v40 = vadd.f32 %v240_v38, %v233_v37  ;;  %v202_v50 = vadd.f32 %v195_v49, %v190_v45  ;;  %v254_v37 = vld [vmem:[#allocation5 + $0x18] sm:$0xff]  ;;  %v180_v38 = vmin.f32 %v164_v28, %v176_v29 }
  0xcc   :  { %249 = vst.msk [vmem:[#allocation4 + $0x10] sm:$0xff] %vm67_vm0, %v245_v40  ;;  %207 = vst.msk [vmem:[#allocation3] sm:$0xff] %vm67_vm0, %v202_v50  ;;  %v167_v40 = vmax.f32 %v159_v32, 0.8  ;;  %v184_v43 = vsub.f32 0.0, %v180_v38  ;;  %v192_v32 = vld [vmem:[#allocation3 + $0x10] sm:$0xff] }
  0xcd   :  { %v260_v42 = vpop.xlane.xlu1 %259 }
  0xce   :  { %v265_v44 = vmax.f32 %v253_v41, %v260_v42  ;;  %v161_v41 = vmin.f32 %v157_v33, 10.0  ;;  %v171_v45 = vmin.f32 %v167_v40, 1.2  ;;  %v188_v53 = vmul.f32 %v184_v43, %v690_v34 }
  0xcf   :  { %v311_v10 = vld [vmem:[#allocation4 + $0x8] sm:$0xff] }
  0xd0   :  { %269 = vst.msk [vmem:[#allocation5 + $0x10] sm:$0xff] %vm67_vm0, %v265_v44  ;;  %v315_v15 = vsel %vm67_vm0, %v311_v10, 0.0  ;;  %v169_v46 = vmax.f32 %v161_v41, 0.8  ;;  %v331_v50 = vld [vmem:[#allocation5 + $0x8] sm:$0xff]  ;;  %v175_v56 = vmul.f32 %v171_v45, %v93_v47  ;;  %v214_v47 = vld [vmem:[#allocation2 + $0x18] sm:$0xff] }
  0xd2   :  { %v173_v59 = vmin.f32 %v169_v46, 1.2 }
  0xd3   :  { %v312_v14 = vld [vmem:[#allocation4 + $0x10] sm:$0xff]  ;;  %v278_v17 = vld [vmem:[#allocation3] sm:$0xff] }
  0xd4   :  { %v317_v20 = vsel %vm67_vm0, %v312_v14, 0.0  ;;  %423 = vrcp.f32 %v278_v17  ;;  %v177_v7 = vmul.f32 %v173_v59, %v95_v57 }
  0xd7   :  { %v332_v54 = vld [vmem:[#allocation5 + $0x10] sm:$0xff] }
  0xd8   :  { %v336_v1 = vsel %vm67_vm0, %v332_v54, -inf }
  0xd9   :  { %v256_v3 = vpop.xlane.xlu1 %255  ;;  %v236_v2 = vpop.xlane.xlu0 %235 }
  0xda   :  { %v263_v4 = vmax.f32 %v251_v62, %v256_v3  ;;  %v243_v5 = vadd.f32 %v236_v2, %v231_v63  ;;  %v335_v62 = vsel %vm67_vm0, %v331_v50, -inf  ;;  %v165_v2 = vmul.f32 %v161_v41, %v95_v57  ;;  %v212_v41 = vld [vmem:[#allocation2 + $0x8] sm:$0xff] }
  0xdc   :  { %267 = vst.msk [vmem:[#allocation5] sm:$0xff] %vm67_vm0, %v263_v4  ;;  %247 = vst.msk [vmem:[#allocation4] sm:$0xff] %vm67_vm0, %v243_v5 }
  0xdd   :  { %v242_v8 = vpop.xlane.xlu1 %241 }
  0xde   :  { %v246_v9 = vadd.f32 %v242_v8, %v234_v6  ;;  %v424_v44 = vpop.eup %423  ;;  %v179_v6 = vmin.f32 %v163_v55, %v175_v56 }
  0xe0   :  { %250 = vst.msk [vmem:[#allocation4 + $0x18] sm:$0xff] %vm67_vm0, %v246_v9  ;;  %v183_v8 = vsub.f32 0.0, %v179_v6  ;;  %v181_v9 = vmin.f32 %v165_v2, %v177_v7 }
  0xe2   :  { %v187_v10 = vmul.f32 %v183_v8, %v698_v52  ;;  %v185_v12 = vsub.f32 0.0, %v181_v9 }
  0xe3   :  { %v310_v16 = vld [vmem:[#allocation4] sm:$0xff] }
  0xe4   :  { %v314_v19 = vsel %vm67_vm0, %v310_v16, 0.0  ;;  %v330_v49 = vld [vmem:[#allocation5] sm:$0xff]  ;;  %v189_v13 = vmul.f32 %v185_v12, %v703_v58 }
  0xe5   :  { %v316_v24 = vadd.f32 %v315_v15, %v314_v19  ;;  %v334_v61 = vsel %vm67_vm0, %v330_v49, -inf  ;;  %v191_v15 = vld [vmem:[#allocation3 + $0x8] sm:$0xff]  ;;  %v193_v19 = vld [vmem:[#allocation3 + $0x18] sm:$0xff] }
  0xe6   :  { %v338_v4 = vmax.f32 %v334_v61, %v335_v62 }
  0xe7   :  { %v313_v26 = vld [vmem:[#allocation4 + $0x18] sm:$0xff]  ;;  %v318_v27 = vadd.f32 %v317_v20, %v316_v24 }
  0xe8   :  { %v216_v30 = vpop.xlane.xlu0 %215  ;;  %v319_v31 = vsel %vm67_vm0, %v313_v26, 0.0 }
  0xe9   :  { %v223_v35 = vadd.f32 %v216_v30, %v211_v25  ;;  %v320_v36 = vadd.f32 %v319_v31, %v318_v27 }
  0xeb   :  { %227 = vst.msk [vmem:[#allocation2] sm:$0xff] %vm67_vm0, %v223_v35  ;;  %321 = vadd.xlane.f32.xlu1 %v320_v36 }
  0xec   :  { %v262_v39 = vpop.xlane.xlu0 %261 }
  0xed   :  { %v266_v42 = vmax.f32 %v254_v37, %v262_v39 }
  0xef   :  { %270 = vst.msk [vmem:[#allocation5 + $0x18] sm:$0xff] %vm67_vm0, %v266_v42  ;;  %196 = vadd.xlane.f32.xlu1 %v698_v52 }
  0xf2   :  { %v274_v48 = vld [vmem:[#allocation2] sm:$0xff] }
  0xf3   :  { %v283_v51 = vmul.f32 %v424_v44, %v274_v48  ;;  %200 = vadd.xlane.f32.xlu1 %v703_v58 }
  0xf5   :  { %v290_v60 = vsel %vm137_vm1, %v283_v51, 0.0 }
  0xf6   :  { %v294_v63 = vsel %vm67_vm0, %v290_v60, 0.0  ;;  %v333_v0 = vld [vmem:[#allocation5 + $0x18] sm:$0xff] }
  0xf7   :  { %301 = vadd.xlane.f32.xlu0 %v294_v63  ;;  %v337_v3 = vsel %vm67_vm0, %v333_v0, -inf  ;;  %219 = vadd.xlane.f32.xlu1 %v188_v53 }
  0xf8   :  { %v339_v5 = vmax.f32 %v336_v1, %v337_v3 }
  0xfa   :  { %v340_v11 = vmax.f32 %v338_v4, %v339_v5 }
  0xfc   :  { %341 = vmax.xlane.f32.xlu0 %v340_v11 }
 0x100   :  { %198 = vadd.xlane.f32.xlu0 %v690_v34 }
 0x104   :  { %217 = vadd.xlane.f32.xlu0 %v187_v10 }
 0x108   :  { %221 = vadd.xlane.f32.xlu0 %v189_v13 }
 0x178   :  { %v322_v14 = vpop.xlane.xlu1 %321 }
 0x179   :  { %v323_v16 = vrot.slane %v322_v14, 4 }
 0x17b   :  { %v324_v20 = vadd.f32 %v323_v16, %v322_v14 }
 0x17c   :  { %v197_v17 = vpop.xlane.xlu1 %196 }
 0x17d   :  { %v203_v18 = vadd.f32 %v197_v17, %v191_v15  ;;  %v325_v34 = vrot.slane %v324_v20, 2 }
 0x17f   :  { %208 = vst.msk [vmem:[#allocation3 + $0x8] sm:$0xff] %vm67_vm0, %v203_v18  ;;  %v326_v27 = vadd.f32 %v325_v34, %v324_v20 }
 0x180   :  { %v201_v21 = vpop.xlane.xlu1 %200 }
 0x181   :  { %v205_v22 = vadd.f32 %v201_v21, %v193_v19  ;;  %v327_v35 = vrot.slane %v326_v27, 1 }
 0x183   :  { %210 = vst.msk [vmem:[#allocation3 + $0x18] sm:$0xff] %vm67_vm0, %v205_v22  ;;  %v328_v42 = vadd.f32 %v327_v35, %v326_v27 }
 0x184   :  { %v302_v52 = vpop.xlane.xlu0 %301  ;;  %v220_v24 = vpop.xlane.xlu1 %219 }
 0x185   :  { %v303_v25 = vrot.slane %v302_v52, 4  ;;  %v225_v58 = vadd.f32 %v220_v24, %v213_v23 }
 0x187   :  { %v304_v26 = vadd.f32 %v303_v25, %v302_v52  ;;  %229 = vst.msk [vmem:[#allocation2 + $0x10] sm:$0xff] %vm67_vm0, %v225_v58 }
 0x189   :  { %v305_v28 = vrot.slane %v304_v26, 2  ;;  %v342_v29 = vpop.xlane.xlu0 %341 }
 0x18a   :  { %v343_v30 = vrot.slane %v342_v29, 4 }
 0x18b   :  { %v306_v31 = vadd.f32 %v305_v28, %v304_v26 }
 0x18c   :  { %v344_v33 = vmax.f32 %v342_v29, %v343_v30 }
 0x18d   :  { %v307_v36 = vrot.slane %v306_v31, 1  ;;  %v199_v37 = vpop.xlane.xlu0 %198 }
 0x18e   :  { %v345_v38 = vrot.slane %v344_v33, 2  ;;  %v204_v39 = vadd.f32 %v199_v37, %v192_v32 }
 0x18f   :  { %v308_v40 = vadd.f32 %v307_v36, %v306_v31 }
 0x190   :  { %v346_v43 = vmax.f32 %v344_v33, %v345_v38  ;;  %209 = vst.msk [vmem:[#allocation3 + $0x10] sm:$0xff] %vm67_vm0, %v204_v39 }
 0x191   :  { %399 = vpush %v308_v40  ;;  %v218_v44 = vpop.xlane.xlu0 %217 }
 0x192   :  { %401 = vpush %v328_v42  ;;  %v347_v45 = vrot.slane %v346_v43, 1  ;;  %v224_v46 = vadd.f32 %v218_v44, %v212_v41 }
 0x194   :  { %v348_v48 = vmax.f32 %v346_v43, %v347_v45  ;;  %228 = vst.msk [vmem:[#allocation2 + $0x8] sm:$0xff] %vm67_vm0, %v224_v46 }
 0x195   :  { %v222_v49 = vpop.xlane.xlu0 %221 }
 0x196   :  { %403 = vpush %v348_v48  ;;  %v226_v50 = vadd.f32 %v222_v49, %v214_v47 }
 0x198   :  { %230 = vst.msk [vmem:[#allocation2 + $0x18] sm:$0xff] %vm67_vm0, %v226_v50 }
 0x1c2   :  { %s400_s13 = spop %399 }
 0x1c3   :  { %v350_v51 = vstv %s400_s13  ;;  %s402_s14 = spop %401 }
 0x1c4   :  { %351 = vst [vmem:[#allocation12] sm:$0xff] %v350_v51  ;;  %v352_v53 = vstv %s402_s14 }
 0x1c5   :  { %353 = vst [vmem:[#allocation13] sm:$0xff] %v352_v53 }
 0x1c6   :  { %502 = shalt.err (!%p499_p0)
}
 0x1c7   :  { %s503_s20 = scalar_lea.hbm %s781_s4, 128 }
 0x1c8   :  { %p504_p1 = scmp.ne.s32.totalorder %s781_s4, %s503_s20  ;;  %p507_p2 = scmp.lt.u32.totalorder %s503_s20, %s781_s4 }
 0x1ca   :  { %p509_p3 = pnand %p507_p2, %p504_p1 }
 0x1cc   :  { %512 = shalt.err (!%p509_p3)
}
 0x1cd   :  { %365 = dma.vmem_to_hbm [thread:$0]  %s363_s3, 128, %s781_s4, [#allocation8]  }
 0x1ce   :  { %s513_s27 = scalar_lea.vmem %s734_s10, 128  ;;  %p518_p5 = scmp.lt.s32.totalorder %s734_s10, %s734_s10 }
 0x1cf   :  { %p514_p4 = scmp.ne.s32.totalorder %s734_s10, %s513_s27  ;;  %p519_p6 = scmp.lt.s32.totalorder %s513_s27, %s513_s27 }
 0x1d1   :  { %p520_p7 = por %p519_p6, %p518_p5 }
 0x1d3   :  { %p521_p8 = pnand %p520_p7, %p514_p4 }
 0x1d5   :  { %524 = shalt.err (!%p521_p8)
}
 0x1d6   :  { %s525_s30 = scalar_lea.hbm %s782_s5, 128 }
 0x1d7   :  { %p526_p9 = scmp.ne.s32.totalorder %s782_s5, %s525_s30  ;;  %p529_p10 = scmp.lt.u32.totalorder %s525_s30, %s782_s5 }
 0x1d9   :  { %p531_p11 = pnand %p529_p10, %p526_p9 }
 0x1db   :  { %534 = shalt.err (!%p531_p11)
}
 0x1dc   :  { %375 = dma.vmem_to_hbm [thread:$0]  %s734_s10, 128, %s782_s5, [#allocation14]  }
 0x1dd   :  { %s404_s12 = spop %403  ;;  %s535_s2 = scalar_lea.vmem %s383_s16, 128 }
 0x1de   :  { %v354_v54 = vstv %s404_s12  ;;  %p536_p12 = scmp.ne.s32.totalorder %s383_s16, %s535_s2  ;;  %p540_p13 = scmp.lt.s32.totalorder %s383_s16, %s383_s16 }
 0x1df   :  { %355 = vst [vmem:[#allocation15] sm:$0xff] %v354_v54  ;;  %p541_p0 = scmp.lt.s32.totalorder %s535_s2, %s535_s2 }
 0x1e1   :  { %p542_p1 = por %p541_p0, %p540_p13 }
 0x1e3   :  { %p543_p2 = pnand %p542_p1, %p536_p12 }
 0x1e5   :  { %546 = shalt.err (!%p543_p2)
}
 0x1e6   :  { %s547_s13 = scalar_lea.hbm %s783_s6, 128 }
 0x1e7   :  { %p548_p3 = scmp.ne.s32.totalorder %s783_s6, %s547_s13  ;;  %p551_p4 = scmp.lt.u32.totalorder %s547_s13, %s783_s6 }
 0x1e9   :  { %p553_p5 = pnand %p551_p4, %p548_p3 }
 0x1eb   :  { %556 = shalt.err (!%p553_p5)
}
 0x1ec   :  { %385 = dma.vmem_to_hbm [thread:$0]  %s383_s16, 128, %s783_s6, [#allocation14]  }
 0x1ed   :  { %561 = dma.done.wait [#allocation8], 128  }
 0x1ee   :  { %562 = vsyncadd [#allocation8], 4294967168 }
 0x1ef   :  { %563 = dma.done.wait [#allocation14], 256  }
 0x1f0   :  { %564 = vsyncadd [#allocation14], 4294967040 }
 0x1f1   :  { %395 = vsyncpa [#allocation7], 1 }
 0x1f2   :  { %396 = vsyncpa [#allocation10], 1 }
 0x1f3   :  { %397 = vsyncpa [#allocation8], 1 }
 0x1f4   :  { %398 = vsyncpa [#allocation14], 1 }

</bundles_post_ra>
